<compile_context>
chip_gen: v7x
topology: tpu7x:2x2x1
jax: 0.10.0
libtpu: 0.0.40
codegen_flags: <defaults>
</compile_context>

<pallas_src>
import jax
import jax.numpy as jnp
from jax.experimental import pallas as pl
from jax.experimental.pallas import tpu as pltpu


def fcnn_kernel(x_ref, w1_ref, b1_ref, w2_ref, b2_ref, w4_ref, b4_ref, o_ref):
    # Compute dtype follows the parameter dtype (f32 or bf16); accumulation and
    # elementwise nonlinearity math are always f32.
    cdt = w1_ref.dtype
    x = x_ref[...].astype(cdt)

    # layer1 + sigmoid  (sigmoid(z) == 0.5*(tanh(z/2)+1): single EUP op)
    z1 = jnp.dot(x, w1_ref[...], preferred_element_type=jnp.float32)
    z1 = z1 + b1_ref[...].astype(jnp.float32)
    h1 = (0.5 * (jnp.tanh(0.5 * z1) + 1.0)).astype(cdt)

    # layer2 + sigmoid
    z2 = jnp.dot(h1, w2_ref[...], preferred_element_type=jnp.float32)
    z2 = z2 + b2_ref[...].astype(jnp.float32)
    h2 = (0.5 * (jnp.tanh(0.5 * z2) + 1.0)).astype(cdt)

    # layer4 on h2 (no nonlinearity). layer3 is dead code in the reference
    # forward (its result is never used) and is deliberately omitted.
    out = jnp.dot(h2, w4_ref[...], preferred_element_type=jnp.float32)
    out = out + b4_ref[...].astype(jnp.float32)
    o_ref[...] = out.astype(o_ref.dtype)


def fcnn_forward(x, params, *, max_tile_b=1024):
    """x: [B, input_dim]. params: dict with w1/b1, w2/b2, w4/b4 (w3/b3 ignored:
    dead in the reference forward). Weights are [in, out] (PyTorch weight.T),
    biases [1, out]. Returns [B, num_classes] float32."""
    B, input_dim = x.shape
    n_h1 = params["w1"].shape[1]
    n_h2 = params["w2"].shape[1]
    num_classes = params["w4"].shape[1]

    # Lane-dense output: pad layer4 to a multiple of 128 output lanes.
    out_pad = max(128, ((num_classes + 127) // 128) * 128)
    w4 = jnp.pad(params["w4"], ((0, 0), (0, out_pad - num_classes)))
    b4 = jnp.pad(params["b4"], ((0, 0), (0, out_pad - num_classes)))

    # Batch tile: full batch if small, else up to max_tile_b rows per grid step.
    TB = B if B <= max_tile_b else max_tile_b
    grid = (pl.cdiv(B, TB),)

    tile_map = lambda i: (i, 0)   # x / out: march along the batch axis
    pin_map = lambda i: (0, 0)    # weights / biases: VMEM-resident across grid

    out = pl.pallas_call(
        fcnn_kernel,
        out_shape=jax.ShapeDtypeStruct((B, out_pad), jnp.float32),
        grid=grid,
        in_specs=[
            pl.BlockSpec((TB, input_dim), tile_map),
            pl.BlockSpec((input_dim, n_h1), pin_map),
            pl.BlockSpec((1, n_h1), pin_map),
            pl.BlockSpec((n_h1, n_h2), pin_map),
            pl.BlockSpec((1, n_h2), pin_map),
            pl.BlockSpec((n_h2, out_pad), pin_map),
            pl.BlockSpec((1, out_pad), pin_map),
        ],
        out_specs=pl.BlockSpec((TB, out_pad), tile_map),
        compiler_params=pltpu.CompilerParams(
            dimension_semantics=("parallel",)),
    )(x, params["w1"], params["b1"], params["w2"], params["b2"], w4, b4)

    return out[:, :num_classes]


def init_params(key, input_dim, n_hidden=128, num_classes=10):
    """Deterministic init mimicking nn.Linear's U(-1/sqrt(fan_in), 1/sqrt(fan_in)).
    Includes layer3 params to mirror the module, even though the forward never
    uses its output."""
    dims = [(input_dim, n_hidden), (n_hidden, n_hidden),
            (n_hidden, n_hidden), (n_hidden, num_classes)]
    params = {}
    for i, (fan_in, fan_out) in enumerate(dims, start=1):
        key, kw, kb = jax.random.split(key, 3)
        bound = 1.0 / jnp.sqrt(float(fan_in))
        params[f"w{i}"] = jax.random.uniform(
            kw, (fan_in, fan_out), jnp.float32, -bound, bound)  # stored as weight.T
        params[f"b{i}"] = jax.random.uniform(
            kb, (1, fan_out), jnp.float32, -bound, bound)
    return params


def reference_forward(x, params):
    """Pure-JAX reference mirroring the PyTorch forward (p=None). layer3's
    output is computed there but never used, so it is omitted here (identical
    numerics)."""
    h1 = jax.nn.sigmoid(x @ params["w1"] + params["b1"])
    h2 = jax.nn.sigmoid(h1 @ params["w2"] + params["b2"])
    return h2 @ params["w4"] + params["b4"]


if __name__ == "__main__":
    key = jax.random.PRNGKey(0)
    key, kx, kp = jax.random.split(key, 3)

    batch = 8
    input_dim = 32

    x = jax.random.normal(kx, (batch, input_dim), jnp.float32)
    params = init_params(kp, input_dim)
    ref = reference_forward(x, params)

    # f32 path (strict check)
    out = jax.block_until_ready(fcnn_forward(x, params))
    assert out.shape == (batch, 10)
    assert jnp.allclose(out, ref, atol=1e-4, rtol=1e-4), "f32 mismatch vs reference"

    # bf16 params/activations path (v6e/v7x MXU + DMA win), relaxed tolerance.
    params_bf16 = {k: v.astype(jnp.bfloat16) for k, v in params.items()}
    out_bf16 = jax.block_until_ready(
        fcnn_forward(x.astype(jnp.bfloat16), params_bf16))
    assert out_bf16.shape == (batch, 10)
    assert jnp.allclose(out_bf16, ref, atol=5e-2, rtol=5e-2), "bf16 mismatch vs reference"

    print("KERNEL_OK")
</pallas_src>

<mosaic_0001>
module attributes {stable_mosaic.version = 11 : i64} {
  func.func @fcnn_kernel(%arg0: i32, %arg1: memref<8x32xf32, #tpu.memory_space<vmem>>, %arg2: memref<32x128xf32, #tpu.memory_space<vmem>>, %arg3: memref<1x128xf32, #tpu.memory_space<vmem>>, %arg4: memref<128x128xf32, #tpu.memory_space<vmem>>, %arg5: memref<1x128xf32, #tpu.memory_space<vmem>>, %arg6: memref<128x128xf32, #tpu.memory_space<vmem>>, %arg7: memref<1x128xf32, #tpu.memory_space<vmem>>, %arg8: memref<8x128xf32, #tpu.memory_space<vmem>>) attributes {dimension_semantics = [#tpu.dimension_semantics<parallel>], iteration_bounds = array<i64: 1>, scalar_prefetch = 0 : i64, scratch_operands = 0 : i64, tpu.core_type = #tpu.core_type<tc>, window_params = [{transform_indices = @transform_0, window_bounds = array<i64: 8, 32>}, {pipeline_mode = #tpu.pipeline_mode<synchronous>, transform_indices = @transform_1, window_bounds = array<i64: 32, 128>}, {pipeline_mode = #tpu.pipeline_mode<synchronous>, transform_indices = @transform_2, window_bounds = array<i64: 1, 128>}, {pipeline_mode = #tpu.pipeline_mode<synchronous>, transform_indices = @transform_3, window_bounds = array<i64: 128, 128>}, {pipeline_mode = #tpu.pipeline_mode<synchronous>, transform_indices = @transform_4, window_bounds = array<i64: 1, 128>}, {pipeline_mode = #tpu.pipeline_mode<synchronous>, transform_indices = @transform_5, window_bounds = array<i64: 128, 128>}, {pipeline_mode = #tpu.pipeline_mode<synchronous>, transform_indices = @transform_6, window_bounds = array<i64: 1, 128>}, {transform_indices = @transform_7, window_bounds = array<i64: 8, 128>}]} {
    %c0 = arith.constant 0 : index
    %c0_0 = arith.constant 0 : index
    %0 = vector.load %arg1[%c0, %c0_0] : memref<8x32xf32, #tpu.memory_space<vmem>>, vector<8x32xf32>
    %c0_1 = arith.constant 0 : index
    %c0_2 = arith.constant 0 : index
    %1 = vector.load %arg2[%c0_1, %c0_2] : memref<32x128xf32, #tpu.memory_space<vmem>>, vector<32x128xf32>
    %cst = arith.constant dense<0.000000e+00> : vector<8x128xf32>
    %2 = tpu.matmul %0, %1, %cst {dimension_numbers = #tpu.dot_dimension_numbers<[1], [0], [0], [1], [0, 0, 1, 1], [], []>} : vector<8x32xf32>, vector<32x128xf32>, vector<8x128xf32> -> vector<8x128xf32>
    %c0_3 = arith.constant 0 : index
    %c0_4 = arith.constant 0 : index
    %3 = vector.load %arg3[%c0_3, %c0_4] : memref<1x128xf32, #tpu.memory_space<vmem>>, vector<1x128xf32>
    %4 = vector.broadcast %3 : vector<1x128xf32> to vector<8x128xf32>
    %5 = arith.addf %2, %4 : vector<8x128xf32>
    %cst_5 = arith.constant 5.000000e-01 : f32
    %6 = vector.broadcast %cst_5 : f32 to vector<8x128xf32>
    %7 = arith.mulf %6, %5 : vector<8x128xf32>
    %8 = math.tanh %7 : vector<8x128xf32>
    %cst_6 = arith.constant 1.000000e+00 : f32
    %9 = vector.broadcast %cst_6 : f32 to vector<8x128xf32>
    %10 = arith.addf %8, %9 : vector<8x128xf32>
    %cst_7 = arith.constant 5.000000e-01 : f32
    %11 = vector.broadcast %cst_7 : f32 to vector<8x128xf32>
    %12 = arith.mulf %11, %10 : vector<8x128xf32>
    %c0_8 = arith.constant 0 : index
    %c0_9 = arith.constant 0 : index
    %13 = vector.load %arg4[%c0_8, %c0_9] : memref<128x128xf32, #tpu.memory_space<vmem>>, vector<128x128xf32>
    %cst_10 = arith.constant dense<0.000000e+00> : vector<8x128xf32>
    %14 = tpu.matmul %12, %13, %cst_10 {dimension_numbers = #tpu.dot_dimension_numbers<[1], [0], [0], [1], [0, 0, 1, 1], [], []>} : vector<8x128xf32>, vector<128x128xf32>, vector<8x128xf32> -> vector<8x128xf32>
    %c0_11 = arith.constant 0 : index
    %c0_12 = arith.constant 0 : index
    %15 = vector.load %arg5[%c0_11, %c0_12] : memref<1x128xf32, #tpu.memory_space<vmem>>, vector<1x128xf32>
    %16 = vector.broadcast %15 : vector<1x128xf32> to vector<8x128xf32>
    %17 = arith.addf %14, %16 : vector<8x128xf32>
    %cst_13 = arith.constant 5.000000e-01 : f32
    %18 = vector.broadcast %cst_13 : f32 to vector<8x128xf32>
    %19 = arith.mulf %18, %17 : vector<8x128xf32>
    %20 = math.tanh %19 : vector<8x128xf32>
    %cst_14 = arith.constant 1.000000e+00 : f32
    %21 = vector.broadcast %cst_14 : f32 to vector<8x128xf32>
    %22 = arith.addf %20, %21 : vector<8x128xf32>
    %cst_15 = arith.constant 5.000000e-01 : f32
    %23 = vector.broadcast %cst_15 : f32 to vector<8x128xf32>
    %24 = arith.mulf %23, %22 : vector<8x128xf32>
    %c0_16 = arith.constant 0 : index
    %c0_17 = arith.constant 0 : index
    %25 = vector.load %arg6[%c0_16, %c0_17] : memref<128x128xf32, #tpu.memory_space<vmem>>, vector<128x128xf32>
    %cst_18 = arith.constant dense<0.000000e+00> : vector<8x128xf32>
    %26 = tpu.matmul %24, %25, %cst_18 {dimension_numbers = #tpu.dot_dimension_numbers<[1], [0], [0], [1], [0, 0, 1, 1], [], []>} : vector<8x128xf32>, vector<128x128xf32>, vector<8x128xf32> -> vector<8x128xf32>
    %c0_19 = arith.constant 0 : index
    %c0_20 = arith.constant 0 : index
    %27 = vector.load %arg7[%c0_19, %c0_20] : memref<1x128xf32, #tpu.memory_space<vmem>>, vector<1x128xf32>
    %28 = vector.broadcast %27 : vector<1x128xf32> to vector<8x128xf32>
    %29 = arith.addf %26, %28 : vector<8x128xf32>
    %c0_21 = arith.constant 0 : index
    %c0_22 = arith.constant 0 : index
    %30 = vector.load %arg8[%c0_21, %c0_22] : memref<8x128xf32, #tpu.memory_space<vmem>>, vector<8x128xf32>
    tpu.vector_store %arg8[%c0_21, %c0_22], %29 {strides = array<i32>} : memref<8x128xf32, #tpu.memory_space<vmem>>, vector<8x128xf32>,
    return
  }
  func.func @transform_0(%arg0: i32) -> (i32, i32) {
    %c0_i32 = arith.constant 0 : i32
    %c0_i32_0 = arith.constant 0 : i32
    return %arg0, %c0_i32 : i32, i32
  }
  func.func @transform_1(%arg0: i32) -> (i32, i32) {
    %c0_i32 = arith.constant 0 : i32
    %c0_i32_0 = arith.constant 0 : i32
    %c0_i32_1 = arith.constant 0 : i32
    return %c0_i32, %c0_i32_0 : i32, i32
  }
  func.func @transform_2(%arg0: i32) -> (i32, i32) {
    %c0_i32 = arith.constant 0 : i32
    %c0_i32_0 = arith.constant 0 : i32
    %c0_i32_1 = arith.constant 0 : i32
    return %c0_i32, %c0_i32_0 : i32, i32
  }
  func.func @transform_3(%arg0: i32) -> (i32, i32) {
    %c0_i32 = arith.constant 0 : i32
    %c0_i32_0 = arith.constant 0 : i32
    %c0_i32_1 = arith.constant 0 : i32
    return %c0_i32, %c0_i32_0 : i32, i32
  }
  func.func @transform_4(%arg0: i32) -> (i32, i32) {
    %c0_i32 = arith.constant 0 : i32
    %c0_i32_0 = arith.constant 0 : i32
    %c0_i32_1 = arith.constant 0 : i32
    return %c0_i32, %c0_i32_0 : i32, i32
  }
  func.func @transform_5(%arg0: i32) -> (i32, i32) {
    %c0_i32 = arith.constant 0 : i32
    %c0_i32_0 = arith.constant 0 : i32
    %c0_i32_1 = arith.constant 0 : i32
    return %c0_i32, %c0_i32_0 : i32, i32
  }
  func.func @transform_6(%arg0: i32) -> (i32, i32) {
    %c0_i32 = arith.constant 0 : i32
    %c0_i32_0 = arith.constant 0 : i32
    %c0_i32_1 = arith.constant 0 : i32
    return %c0_i32, %c0_i32_0 : i32, i32
  }
  func.func @transform_7(%arg0: i32) -> (i32, i32) {
    %c0_i32 = arith.constant 0 : i32
    %c0_i32_0 = arith.constant 0 : i32
    return %arg0, %c0_i32 : i32, i32
  }
}

</mosaic_0001>

<bundles_post_ra>
// kernel: tpu_custom_call.1
= control target key start
LH: loop header
LB: loop body
LE: loop exit
PB: predicated region body
PF: predicated region fallthrough
CT: control target
= control target key end

     0   :  { %12 = vsyncpa [#allocation3], 0  ;;  %s837_s0 = inlined_call_operand.hbm [shape: f32[8,32], index: 0, kind: input, shape index: {}]   ;;  %s838_s1 = inlined_call_operand.hbm [shape: f32[32,128], index: 1, kind: input, shape index: {}]   ;;  %s839_s2 = inlined_call_operand.vmem [shape: f32[1,128], index: 2, kind: input, shape index: {}]   ;;  %s840_s3 = inlined_call_operand.hbm [shape: f32[128,128], index: 3, kind: input, shape index: {}]   ;;  %s841_s4 = inlined_call_operand.vmem [shape: f32[1,128], index: 4, kind: input, shape index: {}]   ;;  %s842_s5 = inlined_call_operand.hbm [shape: f32[128,128], index: 5, kind: input, shape index: {}]   ;;  %s843_s6 = inlined_call_operand.vmem [shape: f32[1,128], index: 6, kind: input, shape index: {}]   ;;  %s844_s7 = inlined_call_operand.hbm [shape: f32[8,128], index: 7, kind: output, shape index: {}]  }
   0x1   :  { %13 = vsyncpa [#allocation6], 0 }
   0x2   :  { %14 = vsyncpa [#allocation9], 0 }
   0x3   :  { %15 = vsyncpa [#allocation4], 0  ;;  %s688_s24 = smov [#allocation5]   ;;  %s570_s28 = scalar_lea.hbm %s838_s1, 512 }
   0x4   :  { %s31_s25 = sshll.u32 %s688_s24, 4  ;;  %p571_p0 = scmp.ne.s32.totalorder %s838_s1, %s570_s28  ;;  %s32_s25 = int_to_ptr.vmem [resolvable:$true] %s31_s25 }
   0x5   :  { %p574_p1 = scmp.lt.u32.totalorder %s570_s28, %s838_s1 }
   0x7   :  { %p576_p2 = pnand %p574_p1, %p571_p0 }
   0x9   :  { %579 = shalt.err (!%p576_p2)
}
   0xa   :  { %s580_s10 = scalar_lea.vmem %s32_s25, 512  ;;  %p585_p4 = scmp.lt.s32.totalorder %s32_s25, %s32_s25 }
   0xb   :  { %p581_p3 = scmp.ne.s32.totalorder %s32_s25, %s580_s10  ;;  %p586_p5 = scmp.lt.s32.totalorder %s580_s10, %s580_s10 }
   0xd   :  { %p587_p6 = por %p586_p5, %p585_p4 }
   0xf   :  { %p588_p7 = pnand %p587_p6, %p581_p3 }
  0x11   :  { %591 = shalt.err (!%p588_p7)
}
  0x12   :  { %s689_s11 = smov 128   ;;  %s690_s12 = smov 8  }
  0x13   :  { %37 = dma.hbm_to_vmem [thread:$0]  %s838_s1, 512, %s32_s25, [#allocation6], %s689_s11, %s689_s11, %s690_s12  }
  0x14   :  { %s691_s15 = smov [#allocation2]   ;;  %s692_s17 = smov [#allocation7]  }
  0x15   :  { %s22_s16 = sshll.u32 %s691_s15, 4  ;;  %s45_s18 = sshll.u32 %s692_s17, 4  ;;  %s23_s16 = int_to_ptr.vmem [resolvable:$true] %s22_s16  ;;  %s46_s18 = int_to_ptr.vmem [resolvable:$true] %s45_s18 }
  0x16   :  { %s592_s21 = scalar_lea.hbm %s837_s0, 128 }
  0x17   :  { %p593_p8 = scmp.ne.s32.totalorder %s837_s0, %s592_s21  ;;  %p596_p9 = scmp.lt.u32.totalorder %s592_s21, %s837_s0 }
  0x19   :  { %p598_p10 = pnand %p596_p9, %p593_p8 }
  0x1b   :  { %601 = shalt.err (!%p598_p10)
}
  0x1c   :  { %s602_s1 = scalar_lea.vmem %s23_s16, 128  ;;  %p607_p12 = scmp.lt.s32.totalorder %s23_s16, %s23_s16 }
  0x1d   :  { %p603_p11 = scmp.ne.s32.totalorder %s23_s16, %s602_s1  ;;  %p608_p13 = scmp.lt.s32.totalorder %s602_s1, %s602_s1 }
  0x1f   :  { %p609_p0 = por %p608_p13, %p607_p12 }
  0x21   :  { %p610_p1 = pnand %p609_p0, %p603_p11 }
  0x23   :  { %613 = shalt.err (!%p610_p1)
}
  0x24   :  { %25 = dma.hbm_to_vmem [thread:$0]  %s837_s0, 128, %s23_s16, [#allocation3]  }
  0x25   :  { %s614_s30 = scalar_lea.hbm %s840_s3, 2048 }
  0x26   :  { %p615_p2 = scmp.ne.s32.totalorder %s840_s3, %s614_s30  ;;  %p618_p3 = scmp.lt.u32.totalorder %s614_s30, %s840_s3 }
  0x28   :  { %p620_p4 = pnand %p618_p3, %p615_p2 }
  0x2a   :  { %623 = shalt.err (!%p620_p4)
}
  0x2b   :  { %s624_s14 = scalar_lea.vmem %s46_s18, 2048  ;;  %p629_p6 = scmp.lt.s32.totalorder %s46_s18, %s46_s18 }
  0x2c   :  { %p625_p5 = scmp.ne.s32.totalorder %s46_s18, %s624_s14  ;;  %p630_p7 = scmp.lt.s32.totalorder %s624_s14, %s624_s14 }
  0x2e   :  { %p631_p8 = por %p630_p7, %p629_p6 }
  0x30   :  { %p632_p9 = pnand %p631_p8, %p625_p5 }
  0x32   :  { %635 = shalt.err (!%p632_p9)
}
  0x33   :  { %51 = dma.hbm_to_vmem [thread:$0]  %s840_s3, 2048, %s46_s18, [#allocation6], %s689_s11, %s689_s11, %s690_s12  }
  0x34   :  { %s693_s16 = smov [#allocation8]   ;;  %s636_s21 = scalar_lea.hbm %s842_s5, 2048 }
  0x35   :  { %s59_s17 = sshll.u32 %s693_s16, 4  ;;  %p637_p10 = scmp.ne.s32.totalorder %s842_s5, %s636_s21  ;;  %s60_s17 = int_to_ptr.vmem [resolvable:$true] %s59_s17 }
  0x36   :  { %p640_p11 = scmp.lt.u32.totalorder %s636_s21, %s842_s5 }
  0x38   :  { %p642_p12 = pnand %p640_p11, %p637_p10 }
  0x3a   :  { %645 = shalt.err (!%p642_p12)
}
  0x3b   :  { %s646_s1 = scalar_lea.vmem %s60_s17, 2048  ;;  %p651_p0 = scmp.lt.s32.totalorder %s60_s17, %s60_s17 }
  0x3c   :  { %p647_p13 = scmp.ne.s32.totalorder %s60_s17, %s646_s1  ;;  %p652_p1 = scmp.lt.s32.totalorder %s646_s1, %s646_s1 }
  0x3e   :  { %p653_p2 = por %p652_p1, %p651_p0 }
  0x40   :  { %p654_p3 = pnand %p653_p2, %p647_p13 }
  0x42   :  { %657 = shalt.err (!%p654_p3)
}
  0x43   :  { %65 = dma.hbm_to_vmem [thread:$0]  %s842_s5, 2048, %s60_s17, [#allocation9], %s689_s11, %s689_s11, %s690_s12  }
  0x44   :  { %680 = dma.done.wait [#allocation3], 128  }
  0x45   :  { %681 = vsyncadd [#allocation3], 4294967168 }
  0x46   :  { %682 = dma.done.wait [#allocation6], 2560  }
  0x47   :  { %683 = vsyncadd [#allocation6], 4294964736 }
  0x48   :  { %684 = dma.done.wait [#allocation9], 2048  }
  0x49   :  { %685 = vsyncadd [#allocation9], 4294965248  ;;  %v694_v0 = vmov 0.0|0.0   ;;  %vm695_vm0 = vmmov 0   ;;  %v696_v1 = vmov 0.0   ;;  %v81_v2 = vld [vmem:[#allocation5] sm:$0xff] }
  0x4a   :  { %502 = vmatprep.subr.bf16.mxu0 %v694_v0  ;;  %429 = vmatprep.mubr.msk.f32.mxu0 %vm695_vm0, %v696_v1  ;;  %v82_v3 = vld [vmem:[#allocation5 + $0x8] sm:$0xff]  ;;  %v83_v4 = vld [vmem:[#allocation5 + $0x10] sm:$0xff]  ;;  %v84_v6 = vld [vmem:[#allocation5 + $0x18] sm:$0xff]  ;;  %vm92_vm1 = vcmask 261120   ;;  %s697_s28 = smov [#allocation10]  }
  0x4b   :  { %508 = vmatprep.subr.bf16.mxu1 %v694_v0  ;;  %464 = vmatprep.mubr.msk.f32.mxu1 %vm695_vm0, %v696_v1  ;;  %v503_v5 = vpack.c.bf16 %v82_v3, %v81_v2  ;;  %v170_v7 = vld [vmem:[#allocation7] sm:$0xff]  ;;  %v171_v8 = vld [vmem:[#allocation7 + $0x8] sm:$0xff]  ;;  %v172_v9 = vld [vmem:[#allocation7 + $0x10] sm:$0xff]  ;;  %v506_v11 = vpack.c.bf16 %v84_v6, %v83_v4  ;;  %s367_s29 = sshll.u32 %s697_s28, 4  ;;  %s368_s29 = int_to_ptr.vmem [resolvable:$true] %s367_s29 }
  0x4c   :  { %v173_v10 = vld [vmem:[#allocation7 + $0x18] sm:$0xff]  ;;  %v509_v12 = vpack.c.bf16 %v171_v8, %v170_v7  ;;  %v174_v14 = vld [vmem:[#allocation7 + $0x20] sm:$0xff]  ;;  %v175_v15 = vld [vmem:[#allocation7 + $0x28] sm:$0xff]  ;;  %p663_p5 = scmp.lt.s32.totalorder %s368_s29, %s368_s29 }
  0x4d   :  { %504 = vmatpush3.bf16.msra.mxu0 %v503_v5  ;;  %v512_v13 = vpack.c.bf16 %v173_v10, %v172_v9  ;;  %v80_v16 = vld [vmem:[#allocation2] sm:$0xff]  ;;  %v515_v17 = vpack.c.bf16 %v175_v15, %v174_v14  ;;  %v176_v18 = vld [vmem:[#allocation7 + $0x30] sm:$0xff]  ;;  %v178_v21 = vld [vmem:[#allocation7 + $0x40] sm:$0xff] }
  0x4e   :  { %505 = vmatprep.subr.bf16.mxu0 %v694_v0  ;;  %510 = vmatpush3.bf16.msra.mxu1 %v509_v12  ;;  %v177_v19 = vld [vmem:[#allocation7 + $0x38] sm:$0xff]  ;;  %v179_v22 = vld [vmem:[#allocation7 + $0x48] sm:$0xff]  ;;  %v180_v24 = vld [vmem:[#allocation7 + $0x50] sm:$0xff] }
  0x4f   :  { %511 = vmatprep.subr.bf16.mxu1 %v694_v0  ;;  %v518_v20 = vpack.c.bf16 %v177_v19, %v176_v18  ;;  %v521_v23 = vpack.c.bf16 %v179_v22, %v178_v21  ;;  %v181_v25 = vld [vmem:[#allocation7 + $0x58] sm:$0xff]  ;;  %v182_v27 = vld [vmem:[#allocation7 + $0x60] sm:$0xff]  ;;  %v183_v28 = vld [vmem:[#allocation7 + $0x68] sm:$0xff] }
  0x50   :  { %v524_v26 = vpack.c.bf16 %v181_v25, %v180_v24  ;;  %v527_v29 = vpack.c.bf16 %v183_v28, %v182_v27  ;;  %v184_v30 = vld [vmem:[#allocation7 + $0x70] sm:$0xff]  ;;  %v185_v31 = vld [vmem:[#allocation7 + $0x78] sm:$0xff]  ;;  %v267_v33 = vld [vmem:[#allocation8] sm:$0xff] }
  0x51   :  { %507 = vmatpush3.bf16.msra.mxu0 %v506_v11  ;;  %v530_v32 = vpack.c.bf16 %v185_v31, %v184_v30  ;;  %v268_v34 = vld [vmem:[#allocation8 + $0x8] sm:$0xff]  ;;  %v269_v35 = vld [vmem:[#allocation8 + $0x10] sm:$0xff]  ;;  %v270_v37 = vld [vmem:[#allocation8 + $0x18] sm:$0xff] }
  0x52   :  { %532 = vmatprep.subr.bf16.mxu0 %v694_v0  ;;  %513 = vmatpush3.bf16.msra.mxu1 %v512_v13  ;;  %v533_v36 = vpack.c.bf16 %v268_v34, %v267_v33  ;;  %v536_v38 = vpack.c.bf16 %v270_v37, %v269_v35  ;;  %v271_v39 = vld [vmem:[#allocation8 + $0x20] sm:$0xff]  ;;  %v272_v40 = vld [vmem:[#allocation8 + $0x28] sm:$0xff]  ;;  %v378_v42 = vld [vmem:[%s839_s2] ss:$0 sm:$0xff] }
  0x53   :  { %514 = vmatprep.subr.bf16.mxu1 %v694_v0  ;;  %v539_v41 = vpack.c.bf16 %v272_v40, %v271_v39  ;;  %v273_v50 = vld [vmem:[#allocation8 + $0x30] sm:$0xff]  ;;  %v274_v51 = vld [vmem:[#allocation8 + $0x38] sm:$0xff]  ;;  %v275_v53 = vld [vmem:[#allocation8 + $0x40] sm:$0xff] }
  0x54   :  { %430 = vmatmul.mubr.msk.f32.vlgmr.msra.gmra.mrb[0].mxu0 %vm92_vm1, %v80_v16  ;;  %v542_v52 = vpack.c.bf16 %v274_v51, %v273_v50  ;;  %v276_v54 = vld [vmem:[#allocation8 + $0x48] sm:$0xff]  ;;  %v277_v56 = vld [vmem:[#allocation8 + $0x50] sm:$0xff]  ;;  %v278_v57 = vld [vmem:[#allocation8 + $0x58] sm:$0xff] }
  0x55   :  { %499 = vmatprep.mubr.msk.f32.mxu0 %vm695_vm0, %v696_v1  ;;  %534 = vmatpush3.bf16.msra.mxu0 %v533_v36  ;;  %v545_v55 = vpack.c.bf16 %v276_v54, %v275_v53  ;;  %v548_v58 = vpack.c.bf16 %v278_v57, %v277_v56  ;;  %v279_v59 = vld [vmem:[#allocation8 + $0x60] sm:$0xff]  ;;  %v280_v60 = vld [vmem:[#allocation8 + $0x68] sm:$0xff]  ;;  %v281_v62 = vld [vmem:[#allocation8 + $0x70] sm:$0xff] }
  0x56   :  { %516 = vmatpush3.bf16.msra.mxu1 %v515_v17  ;;  %535 = vmatprep.subr.bf16.mxu0 %v694_v0  ;;  %v551_v61 = vpack.c.bf16 %v280_v60, %v279_v59  ;;  %v282_v63 = vld [vmem:[#allocation8 + $0x78] sm:$0xff] }
  0x57   :  { %517 = vmatprep.subr.bf16.mxu1 %v694_v0  ;;  %v554_v1 = vpack.c.bf16 %v282_v63, %v281_v62  ;;  %v380_v2 = vld [vmem:[%s841_s4] ss:$0 sm:$0xff]  ;;  %s658_s4 = scalar_lea.vmem %s368_s29, 128 }
  0x58   :  { %p659_p4 = scmp.ne.s32.totalorder %s368_s29, %s658_s4  ;;  %p664_p6 = scmp.lt.s32.totalorder %s658_s4, %s658_s4 }
  0x59   :  { %537 = vmatpush3.bf16.msra.mxu0 %v536_v38 }
  0x5a   :  { %519 = vmatpush3.bf16.msra.mxu1 %v518_v20  ;;  %538 = vmatprep.subr.bf16.mxu0 %v694_v0  ;;  %p665_p7 = por %p664_p6, %p663_p5 }
  0x5b   :  { %520 = vmatprep.subr.bf16.mxu1 %v694_v0 }
  0x5c   :  { %p666_p8 = pnand %p665_p7, %p659_p4 }
  0x5d   :  { %540 = vmatpush3.bf16.msra.mxu0 %v539_v41 }
  0x5e   :  { %522 = vmatpush3.bf16.msra.mxu1 %v521_v23  ;;  %541 = vmatprep.subr.bf16.mxu0 %v694_v0 }
  0x5f   :  { %523 = vmatprep.subr.bf16.mxu1 %v694_v0 }
  0x61   :  { %543 = vmatpush3.bf16.msra.mxu0 %v542_v52 }
  0x62   :  { %525 = vmatpush3.bf16.msra.mxu1 %v524_v26  ;;  %544 = vmatprep.subr.bf16.mxu0 %v694_v0 }
  0x63   :  { %526 = vmatprep.subr.bf16.mxu1 %v694_v0 }
  0x65   :  { %546 = vmatpush3.bf16.msra.mxu0 %v545_v55 }
  0x66   :  { %528 = vmatpush3.bf16.msra.mxu1 %v527_v29  ;;  %547 = vmatprep.subr.bf16.mxu0 %v694_v0 }
  0x67   :  { %529 = vmatprep.subr.bf16.mxu1 %v694_v0 }
  0x69   :  { %549 = vmatpush3.bf16.msra.mxu0 %v548_v58 }
  0x6a   :  { %531 = vmatpush3.bf16.msra.mxu1 %v530_v32  ;;  %550 = vmatprep.subr.bf16.mxu0 %v694_v0 }
  0x6d   :  { %552 = vmatpush3.bf16.msra.mxu0 %v551_v61 }
  0x6e   :  { %553 = vmatprep.subr.bf16.mxu0 %v694_v0  ;;  %v381_v0 = vld [vmem:[%s843_s6] ss:$0 sm:$0xff] }
  0x71   :  { %555 = vmatpush3.bf16.msra.mxu0 %v554_v1 }
 0x127   :  { %v162_v43 = vpop.f32.mrb[0].mxu0 }
 0x128   :  { %v163_v44 = vadd.f32 %v378_v42, %v162_v43  ;;  %v431_v45 = vpop.f32.mrb[1].mxu0 }
 0x12a   :  { %v166_v46 = vmul.f32 0.5, %v163_v44 }
 0x12c   :  { %566 = vtanh.f32 %v166_v46 }
 0x136   :  { %v567_v47 = vpop.eup %566 }
 0x137   :  { %v168_v48 = vadd.f32 1.0, %v567_v47 }
 0x139   :  { %v169_v49 = vmul.f32 0.5, %v168_v48 }
 0x13b   :  { %465 = vmatmul.mubr.f32.vlgmr.msra.gmra.mrb[0].mxu1 %v169_v49 }
 0x20e   :  { %v259_v3 = vpop.f32.mrb[0].mxu1 }
 0x20f   :  { %v260_v4 = vadd.f32 %v380_v2, %v259_v3  ;;  %v466_v5 = vpop.f32.mrb[1].mxu1 }
 0x211   :  { %v263_v6 = vmul.f32 0.5, %v260_v4 }
 0x213   :  { %568 = vtanh.f32 %v263_v6 }
 0x21d   :  { %v569_v7 = vpop.eup %568 }
 0x21e   :  { %v265_v8 = vadd.f32 1.0, %v569_v7 }
 0x220   :  { %v266_v9 = vmul.f32 0.5, %v265_v8 }
 0x222   :  { %500 = vmatmul.mubr.f32.vlgmr.msra.gmra.mrb[2].mxu0 %v266_v9 }
 0x2f5   :  { %v356_v10 = vpop.f32.mrb[2].mxu0 }
 0x2f6   :  { %v357_v11 = vadd.f32 %v381_v0, %v356_v10  ;;  %v501_v12 = vpop.f32.mrb[3].mxu0 }
 0x2f8   :  { %360 = vst [vmem:[#allocation10] sm:$0xff] %v357_v11 }
 0x2f9   :  { %669 = shalt.err (!%p666_p8)
}
 0x2fa   :  { %s670_s9 = scalar_lea.hbm %s844_s7, 128 }
 0x2fb   :  { %p671_p9 = scmp.ne.s32.totalorder %s844_s7, %s670_s9  ;;  %p674_p10 = scmp.lt.u32.totalorder %s670_s9, %s844_s7 }
 0x2fd   :  { %p676_p11 = pnand %p674_p10, %p671_p9 }
 0x2ff   :  { %679 = shalt.err (!%p676_p11)
}
 0x300   :  { %370 = dma.vmem_to_hbm [thread:$0]  %s368_s29, 128, %s844_s7, [#allocation4]  }
 0x301   :  { %686 = dma.done.wait [#allocation4], 128  }
 0x302   :  { %687 = vsyncadd [#allocation4], 4294967168 }
 0x303   :  { %374 = vsyncpa [#allocation3], 1 }
 0x304   :  { %375 = vsyncpa [#allocation6], 1 }
 0x305   :  { %376 = vsyncpa [#allocation9], 1 }
 0x306   :  { %377 = vsyncpa [#allocation4], 1 }

</bundles_post_ra>
